<compile_context>
chip_gen: v6e
topology: v6e:2x2x1
jax: 0.10.0
libtpu: 0.0.40
codegen_flags: <defaults>
</compile_context>

<pallas_src>
import functools
import math

import jax
import jax.numpy as jnp
from jax.experimental import pallas as pl
from jax.experimental.pallas import tpu as pltpu


def _round_up(x, m):
    return ((x + m - 1) // m) * m


def _mse_kernel(pred_ref, tgt_ref, out_ref, acc_ref, *, n_valid):
    i = pl.program_id(0)

    @pl.when(i == 0)
    def _():
        acc_ref[...] = jnp.zeros_like(acc_ref)

    # Per-step: pure elementwise VPU work hidden under the HBM stream.
    p = pred_ref[...].astype(jnp.float32)
    t = tgt_ref[...].astype(jnp.float32)
    d = p - t
    acc_ref[...] += d * d

    @pl.when(i == pl.num_programs(0) - 1)
    def _():
        # Single cross-lane reduction + mean, only once at finalize.
        total = jnp.sum(acc_ref[...])
        mse = total / jnp.float32(n_valid)
        out_ref[...] = jnp.broadcast_to(mse, out_ref.shape).astype(out_ref.dtype)


def ps_loss(pred, target, *, lane=512, max_tile_rows=1024):
    """MSE(mean) of two same-shaped float arrays via a Pallas TPU kernel.

    Returns (mse, {'mse': mse}) to mirror PSLoss.forward.
    """
    assert pred.shape == target.shape, (pred.shape, target.shape)
    n_valid = int(math.prod(pred.shape))

    # Free flatten of contiguous inputs (no transpose, no extra HBM round trip).
    p = pred.reshape(-1)
    t = target.reshape(-1)

    rows = pl.cdiv(n_valid, lane)
    tile_rows = min(max_tile_rows, _round_up(rows, 8))
    rows_padded = _round_up(rows, tile_rows)
    padded_total = rows_padded * lane
    if padded_total != n_valid:
        # Zero-pad both: (0 - 0)^2 == 0, so padding never pollutes the sum.
        p = jnp.pad(p, (0, padded_total - n_valid))
        t = jnp.pad(t, (0, padded_total - n_valid))
    p2 = p.reshape(rows_padded, lane)
    t2 = t.reshape(rows_padded, lane)
    num_tiles = rows_padded // tile_rows

    out = pl.pallas_call(
        functools.partial(_mse_kernel, n_valid=n_valid),
        out_shape=jax.ShapeDtypeStruct((1, 128), jnp.float32),
        grid_spec=pltpu.PrefetchScalarGridSpec(
            num_scalar_prefetch=0,
            grid=(num_tiles,),
            in_specs=[
                pl.BlockSpec((tile_rows, lane), lambda i: (i, 0)),
                pl.BlockSpec((tile_rows, lane), lambda i: (i, 0)),
            ],
            out_specs=pl.BlockSpec((1, 128), lambda i: (0, 0)),
            scratch_shapes=[pltpu.VMEM((tile_rows, lane), jnp.float32)],
        ),
        compiler_params=pltpu.CompilerParams(
            dimension_semantics=("arbitrary",)),
    )(p2, t2)

    mse = out[0, 0]
    return mse, {"mse": mse}


def _reference(pred, target):
    d = pred.astype(jnp.float32) - target.astype(jnp.float32)
    return jnp.mean(d * d)


if __name__ == "__main__":
    key = jax.random.PRNGKey(0)
    k1, k2 = jax.random.split(key)
    N, C, H, W = 2, 4, 16, 16
    pred = jax.random.normal(k1, (N, C, H, W), dtype=jnp.float32)
    target = jax.random.normal(k2, (N, C, H, W), dtype=jnp.float32)

    # Default tiling (single grid step at this toy size).
    loss, parts = ps_loss(pred, target)
    jax.block_until_ready(loss)
    jax.block_until_ready(parts["mse"])

    ref = _reference(pred, target)
    assert jnp.allclose(loss, ref, atol=1e-5, rtol=1e-5), (loss, ref)
    assert jnp.allclose(parts["mse"], ref, atol=1e-5, rtol=1e-5)

    # Small tiles to exercise the multi-step streaming accumulation path
    # (grid > 1, accumulator init/finalize via pl.when).
    loss2, parts2 = ps_loss(pred, target, lane=128, max_tile_rows=8)
    jax.block_until_ready(loss2)
    assert jnp.allclose(loss2, ref, atol=1e-5, rtol=1e-5), (loss2, ref)
    assert jnp.allclose(parts2["mse"], ref, atol=1e-5, rtol=1e-5)

    print("KERNEL_OK")
</pallas_src>

<mosaic_0001>
module attributes {stable_mosaic.version = 11 : i64} {
  func.func @_mse_kernel(%arg0: i32, %arg1: memref<8x512xf32, #tpu.memory_space<vmem>>, %arg2: memref<8x512xf32, #tpu.memory_space<vmem>>, %arg3: memref<1x128xf32, #tpu.memory_space<vmem>>, %arg4: memref<8x512xf32, #tpu.memory_space<vmem>>) attributes {dimension_semantics = [#tpu.dimension_semantics<arbitrary>], iteration_bounds = array<i64: 1>, scalar_prefetch = 0 : i64, scratch_operands = 1 : i64, tpu.core_type = #tpu.core_type<tc>, window_params = [{transform_indices = @transform_0, window_bounds = array<i64: 8, 512>}, {transform_indices = @transform_1, window_bounds = array<i64: 8, 512>}, {pipeline_mode = #tpu.pipeline_mode<synchronous>, transform_indices = @transform_2, window_bounds = array<i64: 1, 128>}]} {
    %c0_i32 = arith.constant 0 : i32
    %0 = arith.cmpi eq, %arg0, %c0_i32 : i32
    %1 = arith.extui %0 : i1 to i32
    %c0_i32_0 = arith.constant 0 : i32
    %2 = arith.cmpi ne, %1, %c0_i32_0 : i32
    scf.if %2 {
      %cst = arith.constant 0.000000e+00 : f32
      %13 = vector.broadcast %cst : f32 to vector<8x512xf32>
      %c0_10 = arith.constant 0 : index
      %c0_11 = arith.constant 0 : index
      %14 = vector.load %arg4[%c0_10, %c0_11] : memref<8x512xf32, #tpu.memory_space<vmem>>, vector<8x512xf32>
      tpu.vector_store %arg4[%c0_10, %c0_11], %13 {strides = array<i32>} : memref<8x512xf32, #tpu.memory_space<vmem>>, vector<8x512xf32>,
    } else {
    }
    %c0 = arith.constant 0 : index
    %c0_1 = arith.constant 0 : index
    %3 = vector.load %arg1[%c0, %c0_1] : memref<8x512xf32, #tpu.memory_space<vmem>>, vector<8x512xf32>
    %c0_2 = arith.constant 0 : index
    %c0_3 = arith.constant 0 : index
    %4 = vector.load %arg2[%c0_2, %c0_3] : memref<8x512xf32, #tpu.memory_space<vmem>>, vector<8x512xf32>
    %5 = arith.subf %3, %4 : vector<8x512xf32>
    %c0_4 = arith.constant 0 : index
    %c0_5 = arith.constant 0 : index
    %6 = vector.load %arg4[%c0_4, %c0_5] : memref<8x512xf32, #tpu.memory_space<vmem>>, vector<8x512xf32>
    %7 = arith.mulf %5, %5 : vector<8x512xf32>
    %8 = arith.addf %6, %7 : vector<8x512xf32>
    %c0_6 = arith.constant 0 : index
    %c0_7 = arith.constant 0 : index
    %9 = vector.load %arg4[%c0_6, %c0_7] : memref<8x512xf32, #tpu.memory_space<vmem>>, vector<8x512xf32>
    tpu.vector_store %arg4[%c0_6, %c0_7], %8 {strides = array<i32>} : memref<8x512xf32, #tpu.memory_space<vmem>>, vector<8x512xf32>,
    %c0_i32_8 = arith.constant 0 : i32
    %10 = arith.cmpi eq, %arg0, %c0_i32_8 : i32
    %11 = arith.extui %10 : i1 to i32
    %c0_i32_9 = arith.constant 0 : i32
    %12 = arith.cmpi ne, %11, %c0_i32_9 : i32
    scf.if %12 {
      %c0_10 = arith.constant 0 : index
      %c0_11 = arith.constant 0 : index
      %13 = vector.load %arg4[%c0_10, %c0_11] : memref<8x512xf32, #tpu.memory_space<vmem>>, vector<8x512xf32>
      %14 = vector.shape_cast %13 : vector<8x512xf32> to vector<1x8x512xf32>
      %cst = arith.constant dense<0.000000e+00> : vector<1xf32>
      %15 = vector.multi_reduction <add>, %14, %cst [1, 2] : vector<1x8x512xf32> to vector<1xf32>
      %16 = vector.shape_cast %15 : vector<1xf32> to vector<1x1x1xf32>
      %17 = vector.extract %16[0, 0, 0] : f32 from vector<1x1x1xf32>
      %cst_12 = arith.constant 2.048000e+03 : f32
      %18 = arith.divf %17, %cst_12 : f32
      %19 = vector.broadcast %18 : f32 to vector<1x128xf32>
      %c0_13 = arith.constant 0 : index
      %c0_14 = arith.constant 0 : index
      %20 = vector.load %arg3[%c0_13, %c0_14] : memref<1x128xf32, #tpu.memory_space<vmem>>, vector<1x128xf32>
      tpu.vector_store %arg3[%c0_13, %c0_14], %19 {strides = array<i32>} : memref<1x128xf32, #tpu.memory_space<vmem>>, vector<1x128xf32>,
    } else {
    }
    return
  }
  func.func @transform_0(%arg0: i32) -> (i32, i32) {
    %c0_i32 = arith.constant 0 : i32
    %c0_i32_0 = arith.constant 0 : i32
    return %arg0, %c0_i32 : i32, i32
  }
  func.func @transform_1(%arg0: i32) -> (i32, i32) {
    %c0_i32 = arith.constant 0 : i32
    %c0_i32_0 = arith.constant 0 : i32
    return %arg0, %c0_i32 : i32, i32
  }
  func.func @transform_2(%arg0: i32) -> (i32, i32) {
    %c0_i32 = arith.constant 0 : i32
    %c0_i32_0 = arith.constant 0 : i32
    %c0_i32_1 = arith.constant 0 : i32
    return %c0_i32, %c0_i32_0 : i32, i32
  }
}

</mosaic_0001>

<bundles_post_ra>
// kernel: tpu_custom_call.1
= control target key start
LH: loop header
LB: loop body
LE: loop exit
PB: predicated region body
PF: predicated region fallthrough
CT: control target
= control target key end

     0   :  { %7 = vsyncpa [#allocation4], 0  ;;  %s210_s0 = inlined_call_operand.hbm [shape: f32[8,512], index: 0, kind: input, shape index: {}]   ;;  %s211_s1 = inlined_call_operand.hbm [shape: f32[8,512], index: 1, kind: input, shape index: {}]   ;;  %s212_s2 = inlined_call_operand.hbm [shape: f32[1,128], index: 2, kind: output, shape index: {}]  }
   0x1   :  { %8 = vsyncpa [#allocation7], 0 }
   0x2   :  { %9 = vsyncpa [#allocation5], 0  ;;  %s183_s9 = smov [#allocation3]   ;;  %s184_s11 = smov [#allocation6]  }
   0x3   :  { %s16_s10 = sshll.u32 %s183_s9, 4  ;;  %s26_s12 = sshll.u32 %s184_s11, 4  ;;  %s17_s10 = int_to_ptr.vmem [resolvable:$true] %s16_s10  ;;  %s27_s12 = int_to_ptr.vmem [resolvable:$true] %s26_s12 }
   0x4   :  { %s125_s13 = scalar_lea.vmem %s17_s10, 512  ;;  %p130_p1 = scmp.lt.s32.totalorder %s17_s10, %s17_s10 }
   0x5   :  { %p126_p0 = scmp.ne.s32.totalorder %s17_s10, %s125_s13  ;;  %p131_p2 = scmp.lt.s32.totalorder %s125_s13, %s125_s13 }
   0x7   :  { %p132_p3 = por %p131_p2, %p130_p1 }
   0x9   :  { %p133_p4 = pnand %p132_p3, %p126_p0 }
   0xb   :  { %136 = shalt.err (!%p133_p4)
}
   0xc   :  { %19 = dma.hbm_to_vmem [thread:$0]  %s210_s0, 512, %s17_s10, [#allocation4]  }
   0xd   :  { %s145_s16 = scalar_lea.vmem %s27_s12, 512  ;;  %p150_p6 = scmp.lt.s32.totalorder %s27_s12, %s27_s12 }
   0xe   :  { %p146_p5 = scmp.ne.s32.totalorder %s27_s12, %s145_s16  ;;  %p151_p7 = scmp.lt.s32.totalorder %s145_s16, %s145_s16 }
  0x10   :  { %p152_p8 = por %p151_p7, %p150_p6 }
  0x12   :  { %p153_p9 = pnand %p152_p8, %p146_p5 }
  0x14   :  { %156 = shalt.err (!%p153_p9)
}
  0x15   :  { %29 = dma.hbm_to_vmem [thread:$0]  %s211_s1, 512, %s27_s12, [#allocation7]  }
  0x16   :  { %177 = dma.done.wait [#allocation4], 512  }
  0x17   :  { %178 = vsyncadd [#allocation4], 4294966784 }
  0x18   :  { %179 = dma.done.wait [#allocation7], 512  }
  0x19   :  { %180 = vsyncadd [#allocation7], 4294966784  ;;  %v44_v0 = vld [vmem:[#allocation3] sm:$0xff]  ;;  %v45_v1 = vld [vmem:[#allocation3 + $0x8] sm:$0xff]  ;;  %s185_s0 = smov [#allocation8]  }
  0x1a   :  { %v46_v2 = vld [vmem:[#allocation3 + $0x10] sm:$0xff]  ;;  %v47_v3 = vld [vmem:[#allocation3 + $0x18] sm:$0xff]  ;;  %v48_v4 = vld [vmem:[#allocation6] sm:$0xff]  ;;  %s102_s1 = sshll.u32 %s185_s0, 4  ;;  %s103_s1 = int_to_ptr.vmem [resolvable:$true] %s102_s1 }
  0x1b   :  { %v49_v5 = vld [vmem:[#allocation6 + $0x8] sm:$0xff]  ;;  %v50_v6 = vld [vmem:[#allocation6 + $0x10] sm:$0xff]  ;;  %v51_v7 = vld [vmem:[#allocation6 + $0x18] sm:$0xff]  ;;  %v52_v8 = vsub.f32 %v44_v0, %v48_v4  ;;  %s157_s21 = scalar_lea.vmem %s103_s1, 16  ;;  %s161_s22 = scalar_lea.vmem %s103_s1, 32 }
  0x1c   :  { %v53_v9 = vsub.f32 %v45_v1, %v49_v5  ;;  %v54_v10 = vsub.f32 %v46_v2, %v50_v6  ;;  %v55_v11 = vsub.f32 %v47_v3, %v51_v7  ;;  %p158_p10 = scmp.ne.s32.totalorder %s103_s1, %s157_s21  ;;  %p162_p11 = scmp.lt.s32.totalorder %s103_s1, %s103_s1 }
  0x1d   :  { %v60_v12 = vmul.f32 %v52_v8, %v52_v8  ;;  %p163_p12 = scmp.lt.s32.totalorder %s161_s22, %s157_s21 }
  0x1e   :  { %v61_v13 = vmul.f32 %v53_v9, %v53_v9  ;;  %v62_v14 = vmul.f32 %v54_v10, %v54_v10  ;;  %v63_v15 = vmul.f32 %v55_v11, %v55_v11 }
  0x1f   :  { %p164_p13 = por %p163_p12, %p162_p11 }
  0x20   :  { %v79_v16 = vadd.f32 %v61_v13, %v60_v12 }
  0x21   :  { %p165_p0 = pnand %p164_p13, %p158_p10 }
  0x22   :  { %v80_v17 = vadd.f32 %v79_v16, %v62_v14 }
  0x24   :  { %v81_v18 = vadd.f32 %v80_v17, %v63_v15 }
  0x26   :  { %82 = vadd.xlane.f32.xlu0 %v81_v18 }
  0xaf   :  { %v83_v19 = vpop.xlane.xlu0 %82 }
  0xb0   :  { %v84_v20 = vrot.slane %v83_v19, 4 }
  0xb2   :  { %v85_v21 = vadd.f32 %v84_v20, %v83_v19 }
  0xb4   :  { %v86_v22 = vrot.slane %v85_v21, 2 }
  0xb6   :  { %v87_v23 = vadd.f32 %v86_v22, %v85_v21 }
  0xb8   :  { %v88_v24 = vrot.slane %v87_v23, 1 }
  0xba   :  { %v89_v25 = vadd.f32 %v88_v24, %v87_v23 }
  0xbc   :  { %112 = vpush %v89_v25 }
  0xed   :  { %s113_s19 = spop %112 }
  0xee   :  { %s93_s20 = smul.f32 0.00048828125, %s113_s19 }
  0xf0   :  { %v94_v26 = vstv %s93_s20 }
  0xf1   :  { %95 = vst [vmem:[#allocation8] sm:$0x1] %v94_v26 }
  0xf2   :  { %168 = shalt.err (!%p165_p0)
}
  0xf3   :  { %105 = dma.vmem_to_hbm [thread:$0]  %s103_s1, 16, %s212_s2, [#allocation5]  }
  0xf4   :  { %181 = dma.done.wait [#allocation5], 16  }
  0xf5   :  { %182 = vsyncadd [#allocation5], 4294967280 }
  0xf6   :  { %109 = vsyncpa [#allocation4], 1 }
  0xf7   :  { %110 = vsyncpa [#allocation7], 1 }
  0xf8   :  { %111 = vsyncpa [#allocation5], 1 }

</bundles_post_ra>
